<compile_context>
chip_gen: v5e
topology: v5e:2x2
jax: 0.10.0
libtpu: 0.0.40
codegen_flags: <defaults>
</compile_context>

<pallas_src>
import functools

import jax
import jax.numpy as jnp
from jax.experimental import pallas as pl
from jax.experimental.pallas import tpu as pltpu


def cbam_kernel(x_ref, w1_ref, b1_ref, w2_ref, b2_ref, cw_ref, cb_ref,
                mask_ref, o_ref, pad_ref, *, ksize, H, W):
    C = x_ref.shape[1]
    HW = H * W
    p = (ksize - 1) // 2
    off = p * W + p                       # data offset inside the padded scratch

    x = x_ref[0]                          # (C, HW) f32, lane-dense

    # ---------------- Channel attention (fused avg+max MLP) ----------------
    avg_col = jnp.mean(x, axis=1, keepdims=True)        # (C, 1)
    max_col = jnp.max(x, axis=1, keepdims=True)         # (C, 1)
    v = jnp.concatenate([avg_col, max_col], axis=1)     # (C, 2) -> one MXU pass, N=2

    h = jnp.dot(w1_ref[...], v, preferred_element_type=jnp.float32) + b1_ref[...]
    h = jnp.maximum(h, 0.0)                              # (mid, 2)
    o2 = jnp.dot(w2_ref[...], h, preferred_element_type=jnp.float32) + b2_ref[...]
    chan = jax.nn.sigmoid(jnp.sum(o2, axis=1, keepdims=True))   # (C, 1)

    # -------- Channel max/avg pools of gated features (no fp kept live) ----
    g = x * chan                                         # transient; only feeds reductions
    ch_max = jnp.max(g, axis=0, keepdims=True)           # (1, HW)
    ch_avg = jnp.sum(g, axis=0, keepdims=True) * (1.0 / C)
    pooled = jnp.concatenate([ch_max, ch_avg], axis=0)   # (2, HW), order [max, avg]

    # ---- zero-padded flattened planes in VMEM scratch (rows zero-padded) ---
    pad_ref[...] = jnp.zeros_like(pad_ref)
    pad_ref[:, pl.ds(off, HW)] = pooled

    # ---- k x k conv as one (1, 2k^2) x (2k^2, HW) MXU matmul over taps -----
    taps = []
    for dy in range(-p, p + 1):
        for dx in range(-p, p + 1):
            s = off + dy * W + dx                        # static slice start >= 0
            sl = pad_ref[:, pl.ds(s, HW)]                # (2, HW) shifted planes
            m = mask_ref[pl.ds(dx + p, 1), :]            # (1, HW) column-validity mask
            taps.append(sl * m)
    tmat = jnp.concatenate(taps, axis=0)                 # (2*k*k, HW)
    conv = (jnp.dot(cw_ref[...], tmat, preferred_element_type=jnp.float32)
            + cb_ref[0, 0])                              # (1, HW)
    att = jax.nn.sigmoid(conv)

    # -------------- Final gating: single lane-dense store -------------------
    o_ref[0] = x * chan * att


def cbam_forward(x, params, *, ksize):
    """x: (B, C, H, W) f32.  params = (W1, b1, W2, b2, conv_w, conv_b)."""
    B, C, H, W = x.shape
    HW = H * W
    W1, b1, W2, b2, conv_w, conv_b = params
    mid = W1.shape[0]
    p = (ksize - 1) // 2
    L = (H + 2 * p) * W + 2 * p                          # padded flat length

    x_flat = x.reshape(B, C, HW)                         # lane-dense layout
    b1c = b1.reshape(mid, 1)
    b2c = b2.reshape(C, 1)
    # Tap-major / channel-minor weight vector: index = (kh*k + kw)*2 + ch,
    # ch 0 = max plane, ch 1 = avg plane (matches torch.cat([max, avg], dim=1)).
    cw_flat = jnp.transpose(conv_w[0], (1, 2, 0)).reshape(1, 2 * ksize * ksize)
    cb2 = conv_b.reshape(1, 1)

    # Column-validity masks (precomputed on host): mask[j, f] = 1 iff column
    # (f % W) + (j - p) stays inside [0, W).
    cols = jnp.arange(HW, dtype=jnp.int32) % W
    col_mask = jnp.stack(
        [((cols + (j - p) >= 0) & (cols + (j - p) < W)).astype(jnp.float32)
         for j in range(ksize)], axis=0)                 # (k, HW)

    # VMEM budget: double-buffered input + output blocks plus small headroom.
    io_bytes = 4 * C * HW * 4
    vmem_limit = int(min(96 * 2**20, max(32 * 2**20, io_bytes + (16 << 20))))

    out_flat = pl.pallas_call(
        functools.partial(cbam_kernel, ksize=ksize, H=H, W=W),
        out_shape=jax.ShapeDtypeStruct((B, C, HW), x.dtype),
        grid_spec=pltpu.PrefetchScalarGridSpec(
            num_scalar_prefetch=0,
            grid=(B,),
            in_specs=[
                pl.BlockSpec((1, C, HW), lambda b: (b, 0, 0)),
                pl.BlockSpec((mid, C), lambda b: (0, 0)),
                pl.BlockSpec((mid, 1), lambda b: (0, 0)),
                pl.BlockSpec((C, mid), lambda b: (0, 0)),
                pl.BlockSpec((C, 1), lambda b: (0, 0)),
                pl.BlockSpec((1, 2 * ksize * ksize), lambda b: (0, 0)),
                pl.BlockSpec(memory_space=pltpu.MemorySpace.SMEM),
                pl.BlockSpec((ksize, HW), lambda b: (0, 0)),
            ],
            out_specs=pl.BlockSpec((1, C, HW), lambda b: (b, 0, 0)),
            scratch_shapes=[pltpu.VMEM((2, L), jnp.float32)],
        ),
        compiler_params=pltpu.CompilerParams(
            dimension_semantics=("parallel",),
            vmem_limit_bytes=vmem_limit),
    )(x_flat, W1, b1c, W2, b2c, cw_flat, cb2, col_mask)

    return out_flat.reshape(B, C, H, W)


def cbam_reference(x, params):
    """Pure-JAX reference mirroring the PyTorch module."""
    W1, b1, W2, b2, conv_w, conv_b = params

    def bneck(v):                                        # v: (B, C)
        h = jnp.maximum(v @ W1.T + b1, 0.0)
        return h @ W2.T + b2

    avg = x.mean(axis=(2, 3))
    mx = x.max(axis=(2, 3))
    sig = jax.nn.sigmoid(bneck(avg) + bneck(mx))         # (B, C)
    fp = x * sig[:, :, None, None]

    ch_max = fp.max(axis=1, keepdims=True)
    ch_avg = fp.mean(axis=1, keepdims=True)
    pool = jnp.concatenate([ch_max, ch_avg], axis=1)     # (B, 2, H, W)
    conv = jax.lax.conv_general_dilated(
        pool, conv_w, window_strides=(1, 1), padding='SAME',
        dimension_numbers=('NCHW', 'OIHW', 'NCHW')) + conv_b.reshape(1, 1, 1, 1)
    att = jax.nn.sigmoid(conv)
    return fp * att


if __name__ == "__main__":
    B, C, H, W = 2, 4, 16, 16
    reduction_ratio = 2
    ksize = 3
    mid = int(C / float(reduction_ratio))

    key = jax.random.PRNGKey(0)
    kx, k1, k2, k3, k4, k5, k6 = jax.random.split(key, 7)

    x = jax.random.normal(kx, (B, C, H, W), jnp.float32)

    # Deterministic synthetic parameters (shapes follow the PyTorch module).
    W1 = jax.random.normal(k1, (mid, C), jnp.float32) * 0.3     # Linear(C, mid).weight
    b1 = jax.random.normal(k2, (mid,), jnp.float32) * 0.1
    W2 = jax.random.normal(k3, (C, mid), jnp.float32) * 0.3     # Linear(mid, C).weight
    b2 = jax.random.normal(k4, (C,), jnp.float32) * 0.1
    conv_w = jax.random.normal(k5, (1, 2, ksize, ksize), jnp.float32) * 0.2
    conv_b = jax.random.normal(k6, (1,), jnp.float32) * 0.1

    params = (W1, b1, W2, b2, conv_w, conv_b)

    out = cbam_forward(x, params, ksize=ksize)
    out = jax.block_until_ready(out)

    ref = jax.block_until_ready(cbam_reference(x, params))
    assert out.shape == (B, C, H, W)
    assert jnp.allclose(out, ref, rtol=1e-4, atol=1e-5), (
        f"max abs err {jnp.max(jnp.abs(out - ref))}")

    print("KERNEL_OK")
</pallas_src>

<mosaic_0001>
module attributes {stable_mosaic.version = 11 : i64} {
  func.func @cbam_kernel(%arg0: i32, %arg1: memref<1x4x256xf32, #tpu.memory_space<vmem>>, %arg2: memref<2x4xf32, #tpu.memory_space<vmem>>, %arg3: memref<2x1xf32, #tpu.memory_space<vmem>>, %arg4: memref<4x2xf32, #tpu.memory_space<vmem>>, %arg5: memref<4x1xf32, #tpu.memory_space<vmem>>, %arg6: memref<1x18xf32, #tpu.memory_space<vmem>>, %arg7: memref<1x1xf32, #tpu.memory_space<smem>>, %arg8: memref<3x256xf32, #tpu.memory_space<vmem>>, %arg9: memref<1x4x256xf32, #tpu.memory_space<vmem>>, %arg10: memref<2x290xf32, #tpu.memory_space<vmem>>) attributes {dimension_semantics = [#tpu.dimension_semantics<parallel>], iteration_bounds = array<i64: 2>, scalar_prefetch = 0 : i64, scratch_operands = 1 : i64, tpu.core_type = #tpu.core_type<tc>, window_params = [{transform_indices = @transform_0, window_bounds = array<i64: 1, 4, 256>}, {pipeline_mode = #tpu.pipeline_mode<synchronous>, transform_indices = @transform_1, window_bounds = array<i64: 2, 4>}, {pipeline_mode = #tpu.pipeline_mode<synchronous>, transform_indices = @transform_2, window_bounds = array<i64: 2, 1>}, {pipeline_mode = #tpu.pipeline_mode<synchronous>, transform_indices = @transform_3, window_bounds = array<i64: 4, 2>}, {pipeline_mode = #tpu.pipeline_mode<synchronous>, transform_indices = @transform_4, window_bounds = array<i64: 4, 1>}, {pipeline_mode = #tpu.pipeline_mode<synchronous>, transform_indices = @transform_5, window_bounds = array<i64: 1, 18>}, {transform_indices = @transform_6, window_bounds = array<i64: 1, 1>}, {pipeline_mode = #tpu.pipeline_mode<synchronous>, transform_indices = @transform_7, window_bounds = array<i64: 3, 256>}, {transform_indices = @transform_8, window_bounds = array<i64: 1, 4, 256>}]} {
    %c0 = arith.constant 0 : index
    %c0_0 = arith.constant 0 : index
    %c0_1 = arith.constant 0 : index
    %0 = vector.load %arg1[%c0, %c0_0, %c0_1] : memref<1x4x256xf32, #tpu.memory_space<vmem>>, vector<1x4x256xf32>
    %1 = vector.shape_cast %0 : vector<1x4x256xf32> to vector<4x256xf32>
    %cst = arith.constant dense<0.000000e+00> : vector<4xf32>
    %2 = vector.multi_reduction <add>, %1, %cst [1] : vector<4x256xf32> to vector<4xf32>
    %3 = vector.shape_cast %2 : vector<4xf32> to vector<4x1xf32>
    %cst_2 = arith.constant 2.560000e+02 : f32
    %4 = vector.broadcast %cst_2 : f32 to vector<4x1xf32>
    %5 = arith.divf %3, %4 : vector<4x1xf32>
    %cst_3 = arith.constant dense<0xFF800000> : vector<4xf32>
    %6 = vector.multi_reduction <maximumf>, %1, %cst_3 [1] : vector<4x256xf32> to vector<4xf32>
    %7 = vector.shape_cast %6 : vector<4xf32> to vector<4x1xf32>
    %8 = tpu.concatenate %5, %7 in 1 : vector<4x1xf32>, vector<4x1xf32> -> vector<4x2xf32>
    %c0_4 = arith.constant 0 : index
    %c0_5 = arith.constant 0 : index
    %9 = vector.load %arg2[%c0_4, %c0_5] : memref<2x4xf32, #tpu.memory_space<vmem>>, vector<2x4xf32>
    %cst_6 = arith.constant dense<0.000000e+00> : vector<2x2xf32>
    %10 = tpu.matmul %9, %8, %cst_6 {dimension_numbers = #tpu.dot_dimension_numbers<[1], [0], [0], [1], [0, 0, 1, 1], [], []>} : vector<2x4xf32>, vector<4x2xf32>, vector<2x2xf32> -> vector<2x2xf32>
    %c0_7 = arith.constant 0 : index
    %c0_8 = arith.constant 0 : index
    %11 = vector.load %arg3[%c0_7, %c0_8] : memref<2x1xf32, #tpu.memory_space<vmem>>, vector<2x1xf32>
    %12 = vector.broadcast %11 : vector<2x1xf32> to vector<2x2xf32>
    %13 = arith.addf %10, %12 : vector<2x2xf32>
    %cst_9 = arith.constant 0.000000e+00 : f32
    %14 = vector.broadcast %cst_9 : f32 to vector<2x2xf32>
    %15 = arith.maximumf %13, %14 : vector<2x2xf32>
    %c0_10 = arith.constant 0 : index
    %c0_11 = arith.constant 0 : index
    %16 = vector.load %arg4[%c0_10, %c0_11] : memref<4x2xf32, #tpu.memory_space<vmem>>, vector<4x2xf32>
    %cst_12 = arith.constant dense<0.000000e+00> : vector<4x2xf32>
    %17 = tpu.matmul %16, %15, %cst_12 {dimension_numbers = #tpu.dot_dimension_numbers<[1], [0], [0], [1], [0, 0, 1, 1], [], []>} : vector<4x2xf32>, vector<2x2xf32>, vector<4x2xf32> -> vector<4x2xf32>
    %c0_13 = arith.constant 0 : index
    %c0_14 = arith.constant 0 : index
    %18 = vector.load %arg5[%c0_13, %c0_14] : memref<4x1xf32, #tpu.memory_space<vmem>>, vector<4x1xf32>
    %19 = vector.broadcast %18 : vector<4x1xf32> to vector<4x2xf32>
    %20 = arith.addf %17, %19 : vector<4x2xf32>
    %cst_15 = arith.constant dense<0.000000e+00> : vector<4xf32>
    %21 = vector.multi_reduction <add>, %20, %cst_15 [1] : vector<4x2xf32> to vector<4xf32>
    %22 = vector.shape_cast %21 : vector<4xf32> to vector<4x1xf32>
    %23 = arith.negf %22 : vector<4x1xf32>
    %24 = math.exp %23 : vector<4x1xf32>
    %cst_16 = arith.constant 1.000000e+00 : f32
    %25 = vector.broadcast %cst_16 : f32 to vector<4x1xf32>
    %26 = arith.addf %25, %24 : vector<4x1xf32>
    %27 = arith.divf %25, %26 : vector<4x1xf32>
    %28 = vector.broadcast %27 : vector<4x1xf32> to vector<4x256xf32>
    %29 = arith.mulf %1, %28 : vector<4x256xf32>
    %cst_17 = arith.constant dense<0xFF800000> : vector<256xf32>
    %30 = vector.multi_reduction <maximumf>, %29, %cst_17 [0] : vector<4x256xf32> to vector<256xf32>
    %31 = vector.shape_cast %30 : vector<256xf32> to vector<1x256xf32>
    %cst_18 = arith.constant dense<0.000000e+00> : vector<256xf32>
    %32 = vector.multi_reduction <add>, %29, %cst_18 [0] : vector<4x256xf32> to vector<256xf32>
    %33 = vector.shape_cast %32 : vector<256xf32> to vector<1x256xf32>
    %cst_19 = arith.constant 2.500000e-01 : f32
    %34 = vector.broadcast %cst_19 : f32 to vector<1x256xf32>
    %35 = arith.mulf %33, %34 : vector<1x256xf32>
    %36 = tpu.concatenate %31, %35 in 0 : vector<1x256xf32>, vector<1x256xf32> -> vector<2x256xf32>
    %cst_20 = arith.constant 0.000000e+00 : f32
    %37 = vector.broadcast %cst_20 : f32 to vector<2x290xf32>
    %c0_21 = arith.constant 0 : index
    %c0_22 = arith.constant 0 : index
    %38 = vector.load %arg10[%c0_21, %c0_22] : memref<2x290xf32, #tpu.memory_space<vmem>>, vector<2x290xf32>
    tpu.vector_store %arg10[%c0_21, %c0_22], %37 {strides = array<i32>} : memref<2x290xf32, #tpu.memory_space<vmem>>, vector<2x290xf32>,
    %c0_23 = arith.constant 0 : index
    %c17 = arith.constant 17 : index
    %39 = vector.load %arg10[%c0_23, %c17] : memref<2x290xf32, #tpu.memory_space<vmem>>, vector<2x256xf32>
    tpu.vector_store %arg10[%c0_23, %c17], %36 {strides = array<i32>} : memref<2x290xf32, #tpu.memory_space<vmem>>, vector<2x256xf32>,
    %c0_24 = arith.constant 0 : index
    %c0_25 = arith.constant 0 : index
    %40 = vector.load %arg10[%c0_24, %c0_25] : memref<2x290xf32, #tpu.memory_space<vmem>>, vector<2x256xf32>
    %c0_26 = arith.constant 0 : index
    %c0_27 = arith.constant 0 : index
    %41 = vector.load %arg8[%c0_26, %c0_27] : memref<3x256xf32, #tpu.memory_space<vmem>>, vector<1x256xf32>
    %42 = vector.broadcast %41 : vector<1x256xf32> to vector<2x256xf32>
    %43 = arith.mulf %40, %42 : vector<2x256xf32>
    %c0_28 = arith.constant 0 : index
    %c1 = arith.constant 1 : index
    %44 = vector.load %arg10[%c0_28, %c1] : memref<2x290xf32, #tpu.memory_space<vmem>>, vector<2x256xf32>
    %c1_29 = arith.constant 1 : index
    %c0_30 = arith.constant 0 : index
    %45 = vector.load %arg8[%c1_29, %c0_30] : memref<3x256xf32, #tpu.memory_space<vmem>>, vector<1x256xf32>
    %46 = vector.broadcast %45 : vector<1x256xf32> to vector<2x256xf32>
    %47 = arith.mulf %44, %46 : vector<2x256xf32>
    %c0_31 = arith.constant 0 : index
    %c2 = arith.constant 2 : index
    %48 = vector.load %arg10[%c0_31, %c2] : memref<2x290xf32, #tpu.memory_space<vmem>>, vector<2x256xf32>
    %c2_32 = arith.constant 2 : index
    %c0_33 = arith.constant 0 : index
    %49 = vector.load %arg8[%c2_32, %c0_33] : memref<3x256xf32, #tpu.memory_space<vmem>>, vector<1x256xf32>
    %50 = vector.broadcast %49 : vector<1x256xf32> to vector<2x256xf32>
    %51 = arith.mulf %48, %50 : vector<2x256xf32>
    %c0_34 = arith.constant 0 : index
    %c16 = arith.constant 16 : index
    %52 = vector.load %arg10[%c0_34, %c16] : memref<2x290xf32, #tpu.memory_space<vmem>>, vector<2x256xf32>
    %c0_35 = arith.constant 0 : index
    %c0_36 = arith.constant 0 : index
    %53 = vector.load %arg8[%c0_35, %c0_36] : memref<3x256xf32, #tpu.memory_space<vmem>>, vector<1x256xf32>
    %54 = vector.broadcast %53 : vector<1x256xf32> to vector<2x256xf32>
    %55 = arith.mulf %52, %54 : vector<2x256xf32>
    %c0_37 = arith.constant 0 : index
    %c17_38 = arith.constant 17 : index
    %56 = vector.load %arg10[%c0_37, %c17_38] : memref<2x290xf32, #tpu.memory_space<vmem>>, vector<2x256xf32>
    %c1_39 = arith.constant 1 : index
    %c0_40 = arith.constant 0 : index
    %57 = vector.load %arg8[%c1_39, %c0_40] : memref<3x256xf32, #tpu.memory_space<vmem>>, vector<1x256xf32>
    %58 = vector.broadcast %57 : vector<1x256xf32> to vector<2x256xf32>
    %59 = arith.mulf %56, %58 : vector<2x256xf32>
    %c0_41 = arith.constant 0 : index
    %c18 = arith.constant 18 : index
    %60 = vector.load %arg10[%c0_41, %c18] : memref<2x290xf32, #tpu.memory_space<vmem>>, vector<2x256xf32>
    %c2_42 = arith.constant 2 : index
    %c0_43 = arith.constant 0 : index
    %61 = vector.load %arg8[%c2_42, %c0_43] : memref<3x256xf32, #tpu.memory_space<vmem>>, vector<1x256xf32>
    %62 = vector.broadcast %61 : vector<1x256xf32> to vector<2x256xf32>
    %63 = arith.mulf %60, %62 : vector<2x256xf32>
    %c0_44 = arith.constant 0 : index
    %c32 = arith.constant 32 : index
    %64 = vector.load %arg10[%c0_44, %c32] : memref<2x290xf32, #tpu.memory_space<vmem>>, vector<2x256xf32>
    %c0_45 = arith.constant 0 : index
    %c0_46 = arith.constant 0 : index
    %65 = vector.load %arg8[%c0_45, %c0_46] : memref<3x256xf32, #tpu.memory_space<vmem>>, vector<1x256xf32>
    %66 = vector.broadcast %65 : vector<1x256xf32> to vector<2x256xf32>
    %67 = arith.mulf %64, %66 : vector<2x256xf32>
    %c0_47 = arith.constant 0 : index
    %c33 = arith.constant 33 : index
    %68 = vector.load %arg10[%c0_47, %c33] : memref<2x290xf32, #tpu.memory_space<vmem>>, vector<2x256xf32>
    %c1_48 = arith.constant 1 : index
    %c0_49 = arith.constant 0 : index
    %69 = vector.load %arg8[%c1_48, %c0_49] : memref<3x256xf32, #tpu.memory_space<vmem>>, vector<1x256xf32>
    %70 = vector.broadcast %69 : vector<1x256xf32> to vector<2x256xf32>
    %71 = arith.mulf %68, %70 : vector<2x256xf32>
    %c0_50 = arith.constant 0 : index
    %c34 = arith.constant 34 : index
    %72 = vector.load %arg10[%c0_50, %c34] : memref<2x290xf32, #tpu.memory_space<vmem>>, vector<2x256xf32>
    %c2_51 = arith.constant 2 : index
    %c0_52 = arith.constant 0 : index
    %73 = vector.load %arg8[%c2_51, %c0_52] : memref<3x256xf32, #tpu.memory_space<vmem>>, vector<1x256xf32>
    %74 = vector.broadcast %73 : vector<1x256xf32> to vector<2x256xf32>
    %75 = arith.mulf %72, %74 : vector<2x256xf32>
    %76 = tpu.concatenate %43, %47, %51, %55, %59, %63, %67, %71, %75 in 0 : vector<2x256xf32>, vector<2x256xf32>, vector<2x256xf32>, vector<2x256xf32>, vector<2x256xf32>, vector<2x256xf32>, vector<2x256xf32>, vector<2x256xf32>, vector<2x256xf32> -> vector<18x256xf32>
    %c0_53 = arith.constant 0 : index
    %c0_54 = arith.constant 0 : index
    %77 = vector.load %arg6[%c0_53, %c0_54] : memref<1x18xf32, #tpu.memory_space<vmem>>, vector<1x18xf32>
    %cst_55 = arith.constant dense<0.000000e+00> : vector<1x256xf32>
    %78 = tpu.matmul %77, %76, %cst_55 {dimension_numbers = #tpu.dot_dimension_numbers<[1], [0], [0], [1], [0, 0, 1, 1], [], []>} : vector<1x18xf32>, vector<18x256xf32>, vector<1x256xf32> -> vector<1x256xf32>
    %c0_56 = arith.constant 0 : index
    %c0_57 = arith.constant 0 : index
    %79 = memref.load %arg7[%c0_56, %c0_57] : memref<1x1xf32, #tpu.memory_space<smem>>
    %80 = vector.broadcast %79 : f32 to vector<1x256xf32>
    %81 = arith.addf %78, %80 : vector<1x256xf32>
    %82 = arith.negf %81 : vector<1x256xf32>
    %83 = math.exp %82 : vector<1x256xf32>
    %cst_58 = arith.constant 1.000000e+00 : f32
    %84 = vector.broadcast %cst_58 : f32 to vector<1x256xf32>
    %85 = arith.addf %84, %83 : vector<1x256xf32>
    %86 = arith.divf %84, %85 : vector<1x256xf32>
    %87 = vector.broadcast %27 : vector<4x1xf32> to vector<4x256xf32>
    %88 = arith.mulf %1, %87 : vector<4x256xf32>
    %89 = vector.broadcast %86 : vector<1x256xf32> to vector<4x256xf32>
    %90 = arith.mulf %88, %89 : vector<4x256xf32>
    %c0_59 = arith.constant 0 : index
    %c0_60 = arith.constant 0 : index
    %c0_61 = arith.constant 0 : index
    %91 = vector.load %arg9[%c0_59, %c0_60, %c0_61] : memref<1x4x256xf32, #tpu.memory_space<vmem>>, vector<1x4x256xf32>
    %92 = vector.shape_cast %91 : vector<1x4x256xf32> to vector<4x256xf32>
    %93 = vector.shape_cast %90 : vector<4x256xf32> to vector<1x4x256xf32>
    tpu.vector_store %arg9[%c0_59, %c0_60, %c0_61], %93 {strides = array<i32>} : memref<1x4x256xf32, #tpu.memory_space<vmem>>, vector<1x4x256xf32>,
    return
  }
  func.func @transform_0(%arg0: i32) -> (i32, i32, i32) {
    %c0_i32 = arith.constant 0 : i32
    %c0_i32_0 = arith.constant 0 : i32
    %c0_i32_1 = arith.constant 0 : i32
    return %arg0, %c0_i32, %c0_i32_0 : i32, i32, i32
  }
  func.func @transform_1(%arg0: i32) -> (i32, i32) {
    %c0_i32 = arith.constant 0 : i32
    %c0_i32_0 = arith.constant 0 : i32
    %c0_i32_1 = arith.constant 0 : i32
    return %c0_i32, %c0_i32_0 : i32, i32
  }
  func.func @transform_2(%arg0: i32) -> (i32, i32) {
    %c0_i32 = arith.constant 0 : i32
    %c0_i32_0 = arith.constant 0 : i32
    %c0_i32_1 = arith.constant 0 : i32
    return %c0_i32, %c0_i32_0 : i32, i32
  }
  func.func @transform_3(%arg0: i32) -> (i32, i32) {
    %c0_i32 = arith.constant 0 : i32
    %c0_i32_0 = arith.constant 0 : i32
    %c0_i32_1 = arith.constant 0 : i32
    return %c0_i32, %c0_i32_0 : i32, i32
  }
  func.func @transform_4(%arg0: i32) -> (i32, i32) {
    %c0_i32 = arith.constant 0 : i32
    %c0_i32_0 = arith.constant 0 : i32
    %c0_i32_1 = arith.constant 0 : i32
    return %c0_i32, %c0_i32_0 : i32, i32
  }
  func.func @transform_5(%arg0: i32) -> (i32, i32) {
    %c0_i32 = arith.constant 0 : i32
    %c0_i32_0 = arith.constant 0 : i32
    %c0_i32_1 = arith.constant 0 : i32
    return %c0_i32, %c0_i32_0 : i32, i32
  }
  func.func @transform_6(%arg0: i32) -> (i32, i32) {
    %c0_i32 = arith.constant 0 : i32
    %c0_i32_0 = arith.constant 0 : i32
    %c0_i32_1 = arith.constant 0 : i32
    return %c0_i32, %c0_i32_0 : i32, i32
  }
  func.func @transform_7(%arg0: i32) -> (i32, i32) {
    %c0_i32 = arith.constant 0 : i32
    %c0_i32_0 = arith.constant 0 : i32
    %c0_i32_1 = arith.constant 0 : i32
    return %c0_i32, %c0_i32_0 : i32, i32
  }
  func.func @transform_8(%arg0: i32) -> (i32, i32, i32) {
    %c0_i32 = arith.constant 0 : i32
    %c0_i32_0 = arith.constant 0 : i32
    %c0_i32_1 = arith.constant 0 : i32
    return %arg0, %c0_i32, %c0_i32_0 : i32, i32, i32
  }
}

</mosaic_0001>

<bundles_post_ra>
// kernel: tpu_custom_call.1
= control target key start
LH: loop header
LB: loop body
LE: loop exit
PB: predicated region body
PF: predicated region fallthrough
CT: control target
= control target key end

     0   :  { %s1517_s0 = inlined_call_operand.hbm [shape: f32[2,4,256], index: 0, kind: input, shape index: {}]   ;;  %s1518_s1 = inlined_call_operand.vmem [shape: f32[2,4], index: 1, kind: input, shape index: {}]   ;;  %s1519_s2 = inlined_call_operand.vmem [shape: f32[2,1], index: 2, kind: input, shape index: {}]   ;;  %s1520_s3 = inlined_call_operand.vmem [shape: f32[4,2], index: 3, kind: input, shape index: {}]   ;;  %s1521_s4 = inlined_call_operand.vmem [shape: f32[4,1], index: 4, kind: input, shape index: {}]   ;;  %s1522_s5 = inlined_call_operand.vmem [shape: f32[1,18], index: 5, kind: input, shape index: {}]   ;;  %s1523_s6 = inlined_call_operand.<no memory space> [shape: f32[1,1], index: 6, kind: input, shape index: {}]   ;;  %s1524_s7 = inlined_call_operand.vmem [shape: f32[3,256], index: 7, kind: input, shape index: {}]   ;;  %s1525_s8 = inlined_call_operand.hbm [shape: f32[2,4,256], index: 8, kind: output, shape index: {}]  }
   0x1   :  { %13 = sst [smem:[#allocation3]] %s1523_s6 }
   0x2   :  { %14 = vsyncpa [#allocation5], 0 }
   0x3   :  { %16 = vsyncpa [#allocation5 + $0x1], 0 }
   0x4   :  { %17 = vsyncpa [#allocation6], 0 }
   0x5   :  { %19 = vsyncpa [#allocation6 + $0x1], 0  ;;  %s1246_s29 = smov 0   ;;  %s1248_s30 = smov 0  }
   0x6   :  { %s1250_s9 = smov 0   ;;  %s1252_s10 = smov 0  }
   0x7 LB: > { %s1267_s6 = sadd.s32 4294967295, %s1176_s10   ;;  %s934_s11 = sadd.s32 4294967294, %s1176_s10   ;;  %s1176_s10 = sphi %s1252_s10, %s1537_s10   ;;  %s1172_s9 = sphi %s1250_s9, %s1536_s9   ;;  %s1168_s30 = sphi %s1248_s30, %s1535_s30   ;;  %s1164_s29 = sphi %s1246_s29, %s1534_s29  }
   0x8   : > { %s1271_s12 = sadd.s32 1, %s1176_s10   ;;  %s32_s13 = sadd.s32 1, %s1172_s9 }
   0x9   : > { %s29_s14 = ssub.s32 %s1176_s10, %s1271_s12  ;;  %p39_p0 = scmp.ne.s32.totalorder %s1172_s9, %s1168_s30 }
   0xa   : > { %p30_p1 = scmp.eq.s32.totalorder %s29_s14, 0  ;;  %p40_p2 = scmp.eq.s32.totalorder %s1176_s10, 0 }
   0xb   : > { %p45_p3 = scmp.ne.s32.totalorder %s1168_s30, %s1164_s29  ;;  %p46_p4 = scmp.eq.s32.totalorder %s1267_s6, 0 }
   0xc   : > { %s1283_s15 = scalar_select %p30_p1, %s1172_s9, %s32_s13  }
   0xd   : > { %p1285_p5 = por %p40_p2, %p39_p0  ;;  %p1289_p6 = por %p46_p4, %p45_p3 }
   0xe   : > { %1526 = sst [smem:[#allocation10_spill]] %s1283_s15  ;;  %p216_p7 = scmp.eq.s32.totalorder %s1267_s6, 1 }
   0xf   : > { %p222_p8 = scmp.eq.s32.totalorder %s934_s11, 1  ;;  %p975_p10 = scmp.lt.s32.totalorder %s1176_s10, 2 }
  0x10   : > { %p1296_p11 = por %p216_p7, %p39_p0  ;;  %s263_s20 = sand.u32 1, %s1172_s9  }
  0x11   : > { %p1300_p12 = por %p222_p8, %p45_p3  ;;  %s961_s21 = sshll.u32 %s1176_s10, 3 }
  0x12   : > { %s937_s22 = sshll.u32 %s263_s20, 3  ;;  %s272_s25 = scalar_lea.hbm %s1517_s0, %s961_s21 }
  0x13   : > { %s274_s26 = sshll.u32 %s272_s25, 4  ;;  %s267_s27 = scalar_lea.vmem [#allocation4], %s937_s22  ;;  %s275_s26 = int_to_ptr.hbm [resolvable:$true] %s274_s26 }
  0x14   : > { %s276_s28 = sshll.u32 %s267_s27, 4  ;;  %p1311_p13 = pnand %p975_p10, %p1285_p5  ;;  %s277_s28 = int_to_ptr.vmem [resolvable:$true] %s276_s28 }
  0x15   : > { %p940_p0 = scmp.ge.s32.totalorder %s1176_s10, 1  ;;  %p281_p1 = scmp.lt.s32.totalorder %s1176_s10, 3 }
  0x16   : > { %s264_s13 = scalar_lea.sflag [#allocation5], %s263_s20  ;;  %s1080_s14 = sshra.s32 %s275_s26, 4  ;;  %s1081_s14 = int_to_ptr.hbm [resolvable:$true] %s1080_s14 }
  0x17   : > { %s1082_s15 = scalar_lea.hbm %s1081_s14, 8  ;;  %p1084_p3 = pneg %p1311_p13 }
  0x18   : > { %p1083_p2 = scmp.ne.s32.totalorder %s1081_s14, %s1082_s15  ;;  %s1087_s16 = scalar_lea.hbm %s1517_s0, 16 }
  0x19   : > { %p1088_p5 = scmp.lt.s32.totalorder %s1081_s14, %s1517_s0  ;;  %p1089_p8 = scmp.lt.s32.totalorder %s1087_s16, %s1082_s15 }
  0x1a   : > { %p1085_p4 = pnand %p1084_p3, %p1083_p2 }
  0x1b   : > { %p1090_p10 = por %p1089_p8, %p1088_p5 }
  0x1c   : > { %p1086_p7 = pneg %p1085_p4 }
  0x1e   : > { %p1091_p9 = pnand %p1090_p10, %p1086_p7 }
  0x20   : > { %1094 = shalt.err (!%p1091_p9)
}
  0x21   : > { %970 = dma.hbm_to_vmem [thread:$0]  (!%p1311_p13), %s275_s26, 128, %s277_s28, %s264_s13  }
  0x22   : > { %p282_p2 = pnand %p940_p0, %p281_p1 }
  0x23   : > { %s1332_s20 = sand.u32 (!%p282_p2), 1, %s1168_s30  }
  0x24   : > { %285 = sbr.rel (%p282_p2) target bundleno = 1103 (0x44f), region = 52  ;;  %s941_s15 = sshll.u32 (!%p282_p2), %s1332_s20, 3 }
  0x25   : > { %s288_s25 = scalar_lea.sflag (!%p282_p2), [#allocation5], %s1332_s20  ;;  %s291_s27 = scalar_lea.vmem (!%p282_p2), [#allocation4], %s941_s15 }
  0x29   : > { %1155 = dma.done.wait (%p1289_p6), %s288_s25, 128  }
  0x2a   : > { %1157 = vsyncadd (%p1289_p6), %s288_s25, 4294967168  ;;  %v1342_v0 = vld [vmem:[%s291_s27] sm:$0xff]  ;;  %vm332_vm0 = vcmask 1043456   ;;  %v1178_v11 = vmov 256.0   ;;  %v359_v12 = vld [vmem:[%s1519_s2] sm:$0x3] }
  0x2b   : > { %327 = vst [vmem:[#allocation1] ss:$2 sm:$0xff] %v1342_v0  ;;  %1066 = vrcp.f32 %v1178_v11  ;;  %v1179_v13 = vmov 0   ;;  %v394_v15 = vld [vmem:[%s1521_s4] sm:$0xf]  ;;  %vm356_vm2 = vcmask 7168  }
  0x2c   : > { %1029 = vset.pattern.permute.xlu1 %v1179_v13  ;;  %1065 = vset.pattern.permute.xlu0 %v1179_v13  ;;  %v358_v24 = vld [vmem:[%s1518_s1] sm:$0x3]  ;;  %vm365_vm3 = vcmask 31744   ;;  %vm404_vm4 = vcmask 1041408   ;;  %vm400_vm5 = vcmask 15360   ;;  %vm428_vm6 = vcmask 11264  }
  0x2d   : > { %362 = vperm.xlu1 %1029, %v359_v12   ;;  %v393_v30 = vld [vmem:[%s1520_s3] sm:$0xf]  ;;  %s1180_s24 = smov 2   ;;  %s1181_s28 = smov 16   ;;  %v1186_v56 = vmov 839922192  }
  0x2e   : > { %v949_v35 = vld [vmem:[%s1524_s7 + $0x2] ss:$4 sm:$0x3]  ;;  %v523_v40 = vld [vmem:[%s1524_s7] ss:$4 sm:$0x3]  ;;  %v453_v57 = vunpack.c.l.s4 %v1186_v56 }
  0x2f   : > { %v549_v36 = vperm.slane %v949_v35, 1  ;;  %v548_v37 = vperm.slane %v949_v35, 0  ;;  %v526_v41 = vperm.slane %v523_v40, 1  ;;  %v525_v44 = vperm.slane %v523_v40, 0  ;;  %s1182_s11 = smov 1   ;;  %s1183_s13 = smov 17  }
  0x30   : > { %v948_v46 = vld [vmem:[%s1524_s7 + $0x1] ss:$4 sm:$0x3]  ;;  %s1184_s14 = smov 32   ;;  %s1185_s21 = smov 33   ;;  %v454_v62 = vunpack.c.0.s8 %v453_v57  ;;  %vm499_vm11 = vcmask 1040384  }
  0x31   : > { %v1067_v14 = vpop.eup %1066  ;;  %v550_v38 = vrot.slane %v549_v36, 6  ;;  %v527_v45 = vrot.slane %v526_v41, 6  ;;  %v535_v48 = vperm.slane %v948_v46, 0  ;;  %v536_v49 = vperm.slane %v948_v46, 1  ;;  %s1187_s22 = smov 18   ;;  %s1188_s16 = smov 34  }
  0x32   : > { %v328_v1 = vld.sshfl [vmem:[#allocation1] sm:$0xff pattern:$0x75316420]  ;;  %v329_v2 = vld.sshfl [vmem:[#allocation1 + $0x8] sm:$0xff pattern:$0x75316420]  ;;  %vm343_vm1 = vweird.f32 %v1067_v14 }
  0x33   : > { %v333_v3 = vsel %vm332_vm0, %v328_v1, 0.0  ;;  %v334_v4 = vsel %vm332_vm0, %v329_v2, 0.0  ;;  %346 = vst [vmem:[#allocation1] ss:$2 sm:$0xff] %v1342_v0  ;;  %v339_v16 = vmul.f32 256.0, %v1067_v14  ;;  %v1370_v39 = vsel %vm404_vm4, %v548_v37, %v550_v38  ;;  %s1190_s23 = smov 127  }
  0x34   : > { %v335_v5 = vadd.f32 %v334_v4, %v333_v3  ;;  %v1380_v47 = vsel %vm404_vm4, %v525_v44, %v527_v45  ;;  %v537_v50 = vrot.slane %v536_v49, 6  ;;  %vm502_vm12 = vcmask 1043458   ;;  %s1192_s25 = smov 112   ;;  %s1193_s27 = smov 111  }
  0x35   : > { %397 = vperm.xlu1 %1029, %v394_v15   ;;  %v340_v17 = vsub.f32 1.0, %v339_v16  ;;  %vm504_vm13 = vcmask 275460   ;;  %vm503_vm14 = vmor %vm502_vm12, %vm404_vm4  ;;  %v1189_v44 = vmov 0.0   ;;  %s1194_s17 = smov 110   ;;  %s1195_s26 = smov 96  }
  0x36   : > { %336 = vadd.xlane.f32.xlu0 %v335_v5  ;;  %v538_v51 = vsel %vm404_vm4, %v535_v48, %v537_v50  ;;  %vm505_vm15 = vmor %vm504_vm13, %vm503_vm14  ;;  %vm667_vm13 = vcmask 908288   ;;  %vm617_vm14 = vcmask 1039360  }
  0x37   : > { %v341_v18 = vmul.f32 %v1067_v14, %v340_v17  ;;  %506 = vst.msk [vmem:[#allocation2] sm:$0x3f] %vm505_vm15, %v1189_v44  ;;  %vm701_vm15 = vcmask 785408  }
  0x39   : > { %v342_v19 = vadd.f32 %v1067_v14, %v341_v18 }
  0x3a   : > { %v347_v6 = vld.sshfl [vmem:[#allocation1] sm:$0xff pattern:$0x75316420]  ;;  %v348_v7 = vld.sshfl [vmem:[#allocation1 + $0x8] sm:$0xff pattern:$0x75316420] }
  0x3b   : > { %v351_v8 = vsel %vm332_vm0, %v347_v6, -inf  ;;  %v352_v9 = vsel %vm332_vm0, %v348_v7, -inf  ;;  %v344_v21 = vsel %vm343_vm1, %v1067_v14, %v342_v19  ;;  %vm517_vm1 = vcmask 1041544  }
  0x3c   : > { %v353_v10 = vmax.f32 %v351_v8, %v352_v9 }
  0x3d   : > { %552 = vrot.lane.b32.xlu1 %v1370_v39, %s1180_s24  ;;  %s1191_s24 = smov 126  }
  0x3e   : > { %354 = vmax.xlane.f32.xlu0 %v353_v10 }
  0x45   : > { %558 = vrot.lane.b32.xlu1 %v1380_v47, %s1181_s28  ;;  %s1196_s28 = smov 95  }
  0x4d   : > { %565 = vrot.lane.b32.xlu1 %v538_v51, %s1183_s13 }
  0x52   : > { %539 = vrot.lane.b32.xlu0 %v538_v51, %s1182_s11  ;;  %s1197_s11 = smov 94  }
  0x55   : > { %585 = vrot.lane.b32.xlu1 %v538_v51, %s1185_s21  ;;  %s751_s21 = sld [smem:[#allocation3]] }
  0x5a   : > { %578 = vrot.lane.b32.xlu0 %v1380_v47, %s1184_s14 }
  0x9f   : > { %v363_v26 = vpop.permute.xlu1 %362 }
  0xa7   : > { %v398_v31 = vpop.permute.xlu1 %397 }
  0xa9   : > { %v337_v20 = vpop.xlane.xlu0 %336 }
  0xaa   : > { %v345_v22 = vmul.f32 %v344_v21, %v337_v20 }
  0xb1   : > { %v355_v23 = vpop.xlane.xlu0 %354 }
  0xb2   : > { %v357_v25 = vsel %vm356_vm2, %v345_v22, %v355_v23 }
  0xb3   : > { %943 = vmatpush.msk.msra.mxu0 %vm332_vm0, %v357_v25 }
  0xb4   : > { %944 = vmatmul.msk.f32.vlgmr.msra.gmra.mxu0 %vm365_vm3, %v358_v24  ;;  %vm518_vm3 = vmor %vm502_vm12, %vm517_vm1  ;;  %vm684_vm12 = vcmask 900096   ;;  %vm634_vm1 = vcmask 1031168  }
  0xc4   : > { %v540_v50 = vpop.permute.xlu0 %539 }
  0xc5   : > { %v541_v51 = vrot.slane %v540_v50, 6 }
 0x131   : > { %v389_v27 = vpop.f32.mrf.mxu0 }
 0x132   : > { %v390_v28 = vadd.f32 %v389_v27, %v363_v26 }
 0x134   : > { %v392_v29 = vmax.f32 %v390_v28, 0.0 }
 0x136   : > { %945 = vmatpush.msk.msra.mxu1 %vm404_vm4, %v392_v29 }
 0x137   : > { %946 = vmatmul.msk.f32.vlgmr.msra.gmra.mxu1 %vm400_vm5, %v393_v30 }
 0x1b4   : > { %v425_v32 = vpop.f32.mrf.mxu1 }
 0x1b5   : > { %v426_v33 = vadd.f32 %v425_v32, %v398_v31 }
 0x1b7   : > { %v429_v34 = vsel %vm428_vm6, %v426_v33, 0.0  ;;  %vm519_vm6 = vcmask 136196  }
 0x1b8   : > { %430 = vadd.xlane.f32.xlu2 %v429_v34 }
 0x22b   : > { %v431_v42 = vpop.xlane.xlu2 %430 }
 0x22c   : > { %v947_v43 = vmul.f32 -1.442695, %v431_v42 }
 0x22e   : > { %1068 = vpow2.f32 %v947_v43 }
 0x234   : > { %v1069_v52 = vpop.eup %1068 }
 0x235   : > { %v435_v53 = vadd.f32 1.0, %v1069_v52 }
 0x237   : > { %1070 = vrcp.f32 %v435_v53  ;;  %v447_v59 = vand.u32 2147483648, %v435_v53  ;;  %v445_v61 = vand.u32 2147483647, %v435_v53  ;;  %vm441_vm8 = vweird.f32 %v435_v53 }
 0x239   : > { %v448_v1 = vor.u32 1.1754944e-38, %v447_v59  ;;  %vm446_vm10 = vcmp.eq.f32.partialorder %v445_v61, 8.507059e+37 }
 0x23d   : > { %v1071_v54 = vpop.eup %1070 }
 0x23e   : > { %v437_v55 = vmul.f32 %v1071_v54, %v435_v53  ;;  %vm442_vm7 = vweird.f32 %v1071_v54  ;;  %v542_v53 = vsel %vm356_vm2, %v541_v51, %v540_v50  ;;  %vm561_vm2 = vcmask 130048  }
 0x23f   : > { %vm443_vm9 = vmor %vm441_vm8, %vm442_vm7  ;;  %vm514_vm7 = vcmask 138240  }
 0x240   : > { %v438_v58 = vsub.f32 1.0, %v437_v55  ;;  %vm520_vm8 = vmor %vm519_vm6, %vm518_vm3  ;;  %vm734_vm3 = vcmask 769024   ;;  %vm718_vm6 = vcmask 777216  }
 0x242   : > { %v439_v60 = vmul.f32 %v1071_v54, %v438_v58 }
 0x244   : > { %v440_v63 = vadd.f32 %v1071_v54, %v439_v60 }
 0x246   : > { %v444_v2 = vsel %vm443_vm9, %v1071_v54, %v440_v63  ;;  %v553_v54 = vpop.permute.xlu1 %552  ;;  %vm581_vm9 = vcmask 261120  }
 0x247   : > { %v449_v3 = vsel %vm446_vm10, %v448_v1, %v444_v2  ;;  %v554_v58 = vrot.slane %v553_v54, 6  ;;  %vm588_vm10 = vcmask 269312  }
 0x248   : > { %v455_v4 = vperm.slane %v449_v3, %v454_v62 }
 0x249   : > { %v555_v59 = vsel %vm400_vm5, %v554_v58, %v553_v54  ;;  %vm574_vm5 = vcmask 146432  }
 0x24a   : > { %v1387_v5 = vmul.f32 %v455_v4, %v1342_v0 }
 0x24c   : > { %459 = vst [vmem:[#allocation1] ss:$2 sm:$0xff] %v1387_v5 }
 0x24e   : > { %v559_v60 = vpop.permute.xlu1 %558 }
 0x24f   : > { %v560_v1 = vrot.slane %v559_v60, 6 }
 0x251   : > { %v562_v3 = vsel %vm561_vm2, %v560_v1, %v559_v60 }
 0x253   : > { %v460_v6 = vld.sshfl [vmem:[#allocation1] sm:$0xff pattern:$0x75316420]  ;;  %v461_v7 = vld.sshfl [vmem:[#allocation1 + $0x8] sm:$0xff pattern:$0x75316420] }
 0x254   : > { %v464_v8 = vsel %vm332_vm0, %v460_v6, -inf  ;;  %v471_v9 = vsel %vm332_vm0, %v461_v7, -inf  ;;  %478 = vst [vmem:[#allocation1] ss:$2 sm:$0xff] %v1387_v5 }
 0x255   : > { %v472_v10 = vrot.slane %v471_v9, 4  ;;  %v465_v11 = vrot.slane %v464_v8, 4 }
 0x257   : > { %v473_v12 = vmax.f32 %v471_v9, %v472_v10  ;;  %v466_v13 = vmax.f32 %v464_v8, %v465_v11  ;;  %v566_v8 = vpop.permute.xlu1 %565 }
 0x258   : > { %v567_v10 = vrot.slane %v566_v8, 6 }
 0x259   : > { %v474_v17 = vrot.slane %v473_v12, 2  ;;  %v467_v20 = vrot.slane %v466_v13, 2 }
 0x25b   : > { %v479_v14 = vld.sshfl [vmem:[#allocation1] sm:$0xff pattern:$0x75316420]  ;;  %v480_v15 = vld.sshfl [vmem:[#allocation1 + $0x8] sm:$0xff pattern:$0x75316420]  ;;  %v475_v23 = vmax.f32 %v473_v12, %v474_v17  ;;  %v468_v26 = vmax.f32 %v466_v13, %v467_v20  ;;  %v568_v12 = vsel %vm514_vm7, %v567_v10, %v566_v8  ;;  %v579_v20 = vpop.permute.xlu0 %578 }
 0x25c   : > { %v483_v16 = vsel %vm332_vm0, %v479_v14, 0.0  ;;  %v490_v0 = vsel %vm332_vm0, %v480_v15, 0.0 }
 0x25d   : > { %v484_v18 = vrot.slane %v483_v16, 4  ;;  %v491_v19 = vrot.slane %v490_v0, 4  ;;  %v476_v29 = vrot.slane %v475_v23, 1  ;;  %v469_v32 = vrot.slane %v468_v26, 1 }
 0x25f   : > { %v485_v21 = vadd.f32 %v484_v18, %v483_v16  ;;  %v492_v22 = vadd.f32 %v491_v19, %v490_v0  ;;  %v477_v35 = vmax.f32 %v475_v23, %v476_v29  ;;  %v470_v38 = vmax.f32 %v468_v26, %v469_v32 }
 0x260   : > { %v580_v26 = vrot.slane %v579_v20, 6 }
 0x261   : > { %v486_v24 = vrot.slane %v485_v21, 2  ;;  %v493_v25 = vrot.slane %v492_v22, 2 }
 0x263   : > { %v487_v27 = vadd.f32 %v486_v24, %v485_v21  ;;  %v494_v28 = vadd.f32 %v493_v25, %v492_v22 }
 0x265   : > { %v488_v30 = vrot.slane %v487_v27, 1  ;;  %v495_v31 = vrot.slane %v494_v28, 1 }
 0x267   : > { %v489_v33 = vadd.f32 %v488_v30, %v487_v27  ;;  %v496_v34 = vadd.f32 %v495_v31, %v494_v28  ;;  %v582_v27 = vsel %vm581_vm9, %v580_v26, %v579_v20  ;;  %v586_v28 = vpop.permute.xlu1 %585 }
 0x269   : > { %v497_v36 = vmul.f32 0.25, %v489_v33  ;;  %v498_v37 = vmul.f32 0.25, %v496_v34  ;;  %v587_v34 = vrot.slane %v586_v28, 6 }
 0x26b   : > { %v501_v40 = vsel %vm499_vm11, %v477_v35, %v498_v37  ;;  %v500_v42 = vsel %vm499_vm11, %v470_v38, %v497_v36  ;;  %v589_v35 = vsel %vm588_vm10, %v587_v34, %v586_v28  ;;  %vm595_vm11 = vcmask 277504  }
 0x26c   : > { %v509_v41 = vrot.slane %v501_v40, 6 }
 0x26e   : > { %v510_v43 = vsel %vm404_vm4, %v500_v42, %v509_v41 }
 0x26f   : > { %511 = vrot.lane.b32.xlu2 %v510_v43, %s1183_s13 }
 0x277   : > { %571 = vrot.lane.b32.xlu2 %v1370_v39, %s1187_s22  ;;  %s962_s22 = sshll.u32 %s1267_s6, 3 }
 0x27f   : > { %592 = vrot.lane.b32.xlu2 %v1370_v39, %s1188_s16 }
 0x2c9   : > { %v512_v45 = vpop.permute.xlu2 %511 }
 0x2ca   : > { %v513_v46 = vrot.slane %v512_v45, 6 }
 0x2cc   : > { %v515_v48 = vsel %vm514_vm7, %v513_v46, %v512_v45  ;;  %vm651_vm7 = vcmask 916480  }
 0x2cd   : > { %521 = vst.msk [vmem:[#allocation2] sm:$0x3f] %vm520_vm8, %v515_v48  ;;  %vm741_vm8 = vcmask 1045504  }
 0x2d1   : > { %v572_v13 = vpop.permute.xlu2 %571 }
 0x2d2   : > { %v573_v17 = vrot.slane %v572_v13, 6 }
 0x2d4   : > { %v522_v49 = vld [vmem:[#allocation2] sm:$0xf]  ;;  %v575_v19 = vsel %vm574_vm5, %v573_v17, %v572_v13 }
 0x2d5   : > { %v530_v39 = vmul.f32 %v1380_v47, %v522_v49  ;;  %v1402_v52 = vld [vmem:[#allocation2] sm:$0x3f] }
 0x2d6   : > { %v544_v55 = vmul.f32 %v542_v53, %v1402_v52  ;;  %v557_v47 = vmul.f32 %v555_v59, %v1402_v52  ;;  %v564_v4 = vmul.f32 %v562_v3, %v1402_v52  ;;  %v570_v14 = vmul.f32 %v568_v12, %v1402_v52 }
 0x2d7   : > { %600 = vst [vmem:[#allocation1] ss:$4 sm:$0xff] %v530_v39  ;;  %v577_v21 = vmul.f32 %v575_v19, %v1402_v52  ;;  %v584_v29 = vmul.f32 %v582_v27, %v1402_v52  ;;  %v591_v37 = vmul.f32 %v589_v35, %v1402_v52 }
 0x2d9   : > { %v593_v36 = vpop.permute.xlu2 %592 }
 0x2da   : > { %v594_v43 = vrot.slane %v593_v36, 6 }
 0x2dc   : > { %v596_v44 = vsel %vm595_vm11, %v594_v43, %v593_v36 }
 0x2dd   : > { %v598_v45 = vmul.f32 %v596_v44, %v1402_v52 }
 0x2de   : > { %v1406_v56 = vld.sshfl [vmem:[#allocation1] sm:$0xff pattern:$0x73625140]  ;;  %v1408_v57 = vld.sshfl [vmem:[#allocation1 + $0x8] sm:$0xff pattern:$0x73625140] }
 0x2df   : > { %607 = vst [vmem:[#allocation1 + $0x1] ss:$4 sm:$0xff] %v544_v55 }
 0x2e6   : > { %v608_v61 = vld.sshfl [vmem:[#allocation1] sm:$0xff pattern:$0x73625140]  ;;  %v609_v62 = vld.sshfl [vmem:[#allocation1 + $0x8] sm:$0xff pattern:$0x73625140] }
 0x2e7   : > { %611 = vrot.lane.b32.xlu0 %v608_v61, %s1190_s23  ;;  %v610_v63 = vld.sshfl [vmem:[#allocation1 + $0x10] sm:$0xff pattern:$0x73625140] }
 0x2e8   : > { %v1030_v2 = vpack.i.bf16 %v610_v63, %v609_v62  ;;  %624 = vst [vmem:[#allocation1 + $0x2] ss:$4 sm:$0xff] %v557_v47 }
 0x2ea   : > { %1031 = vrot.lane.b32.xlu2 %v1030_v2, %s1190_s23 }
 0x2ef   : > { %v1413_v6 = vld.sshfl [vmem:[#allocation1] sm:$0xff pattern:$0x73625140]  ;;  %v626_v7 = vld.sshfl [vmem:[#allocation1 + $0x8] sm:$0xff pattern:$0x73625140] }
 0x2f0   : > { %v627_v9 = vld.sshfl [vmem:[#allocation1 + $0x10] sm:$0xff pattern:$0x73625140] }
 0x2f1   : > { %641 = vst [vmem:[#allocation1 + $0x3] ss:$4 sm:$0xff] %v564_v4  ;;  %v1035_v11 = vpack.i.bf16 %v627_v9, %v626_v7 }
 0x2f3   : > { %1036 = vrot.lane.b32.xlu0 %v1035_v11, %s1191_s24 }
 0x2f8   : > { %v1418_v15 = vld.sshfl [vmem:[#allocation1] sm:$0xff pattern:$0x73625140]  ;;  %v643_v16 = vld.sshfl [vmem:[#allocation1 + $0x8] sm:$0xff pattern:$0x73625140] }
 0x2f9   : > { %v644_v0 = vld.sshfl [vmem:[#allocation1 + $0x10] sm:$0xff pattern:$0x73625140] }
 0x2fa   : > { %v1040_v18 = vpack.i.bf16 %v644_v0, %v643_v16  ;;  %657 = vst [vmem:[#allocation1] ss:$4 sm:$0xff] %v570_v14 }
 0x2fc   : > { %1041 = vrot.lane.b32.xlu1 %v1040_v18, %s1192_s25 }
 0x301   : > { %v659_v22 = vld.sshfl [vmem:[#allocation1 + $0x8] sm:$0xff pattern:$0x73625140]  ;;  %v660_v23 = vld.sshfl [vmem:[#allocation1 + $0x10] sm:$0xff pattern:$0x73625140] }
 0x302   : > { %v1045_v24 = vpack.i.bf16 %v660_v23, %v659_v22  ;;  %v658_v25 = vld.sshfl [vmem:[#allocation1] sm:$0xff pattern:$0x73625140] }
 0x303   : > { %674 = vst [vmem:[#allocation1 + $0x1] ss:$4 sm:$0xff] %v577_v21 }
 0x304   : > { %1046 = vrot.lane.b32.xlu0 %v1045_v24, %s1193_s27 }
 0x30a   : > { %v676_v30 = vld.sshfl [vmem:[#allocation1 + $0x8] sm:$0xff pattern:$0x73625140]  ;;  %v677_v31 = vld.sshfl [vmem:[#allocation1 + $0x10] sm:$0xff pattern:$0x73625140] }
 0x30b   : > { %v1050_v32 = vpack.i.bf16 %v677_v31, %v676_v30  ;;  %v675_v33 = vld.sshfl [vmem:[#allocation1] sm:$0xff pattern:$0x73625140] }
 0x30c   : > { %661 = vrot.lane.b32.xlu0 %v658_v25, %s1193_s27  ;;  %691 = vst [vmem:[#allocation1 + $0x2] ss:$4 sm:$0xff] %v584_v29 }
 0x30d   : > { %1051 = vrot.lane.b32.xlu1 %v1050_v32, %s1194_s17 }
 0x313   : > { %v693_v38 = vld.sshfl [vmem:[#allocation1 + $0x8] sm:$0xff pattern:$0x73625140]  ;;  %v694_v40 = vld.sshfl [vmem:[#allocation1 + $0x10] sm:$0xff pattern:$0x73625140] }
 0x314   : > { %v1055_v41 = vpack.i.bf16 %v694_v40, %v693_v38  ;;  %v692_v42 = vld.sshfl [vmem:[#allocation1] sm:$0xff pattern:$0x73625140] }
 0x315   : > { %678 = vrot.lane.b32.xlu1 %v675_v33, %s1194_s17  ;;  %708 = vst [vmem:[#allocation1 + $0x3] ss:$4 sm:$0xff] %v591_v37  ;;  %s848_s17 = scalar_lea.sflag [#allocation6], %s1332_s20 }
 0x316   : > { %1056 = vrot.lane.b32.xlu2 %v1055_v41, %s1195_s26 }
 0x31c   : > { %v710_v46 = vld.sshfl [vmem:[#allocation1 + $0x8] sm:$0xff pattern:$0x73625140]  ;;  %v711_v48 = vld.sshfl [vmem:[#allocation1 + $0x10] sm:$0xff pattern:$0x73625140] }
 0x31d   : > { %695 = vrot.lane.b32.xlu1 %v692_v42, %s1195_s26  ;;  %v1060_v49 = vpack.i.bf16 %v711_v48, %v710_v46  ;;  %v709_v39 = vld.sshfl [vmem:[#allocation1] sm:$0xff pattern:$0x73625140] }
 0x31e   : > { %724 = vst [vmem:[#allocation1] ss:$4 sm:$0xff] %v598_v45  ;;  %v750_v42 = vld [vmem:[%s1522_s5] sm:$0x1] }
 0x31f   : > { %1061 = vrot.lane.b32.xlu2 %v1060_v49, %s1196_s28 }
 0x325   : > { %v726_v50 = vld.sshfl [vmem:[#allocation1 + $0x8] sm:$0xff pattern:$0x73625140]  ;;  %v727_v51 = vld.sshfl [vmem:[#allocation1 + $0x10] sm:$0xff pattern:$0x73625140] }
 0x326   : > { %730 = vrot.lane.b32.xlu0 %v726_v50, %s1197_s11  ;;  %732 = vrot.lane.b32.xlu1 %v727_v51, %s1197_s11  ;;  %v725_v53 = vld.sshfl [vmem:[#allocation1] sm:$0xff pattern:$0x73625140]  ;;  %v752_v51 = vstv %s751_s21 }
 0x327   : > { %728 = vrot.lane.b32.xlu2 %v725_v53, %s1197_s11 }
 0x32e   : > { %628 = vrot.lane.b32.xlu0 %v1413_v6, %s1191_s24  ;;  %645 = vrot.lane.b32.xlu1 %v1418_v15, %s1192_s25  ;;  %s859_s24 = scalar_lea.hbm %s1525_s8, %s962_s22  ;;  %s324_s25 = scalar_lea.vmem [#allocation7], %s941_s15 }
 0x32f   : > { %712 = vrot.lane.b32.xlu2 %v709_v39, %s1196_s28  ;;  %s861_s27 = sshll.u32 %s324_s25, 4  ;;  %s863_s6 = sshll.u32 %s859_s24, 4  ;;  %s862_s27 = int_to_ptr.vmem [resolvable:$true] %s861_s27  ;;  %s864_s6 = int_to_ptr.hbm [resolvable:$true] %s863_s6 }
 0x330   : > { %s1124_s26 = sshra.s32 %s864_s6, 4  ;;  %s1130_s15 = scalar_lea.hbm %s1525_s8, 16  ;;  %s1125_s26 = int_to_ptr.hbm [resolvable:$true] %s1124_s26 }
 0x331   : > { %s1126_s28 = scalar_lea.hbm %s1125_s26, 8  ;;  %p1131_p0 = scmp.lt.s32.totalorder %s1125_s26, %s1525_s8 }
 0x332   : > { %p1127_p6 = scmp.ne.s32.totalorder %s1125_s26, %s1126_s28  ;;  %p1132_p1 = scmp.lt.s32.totalorder %s1130_s15, %s1126_s28 }
 0x334   : > { %p1128_p9 = pnand %p1127_p6, %p1296_p11  ;;  %p1133_p3 = por %p1132_p1, %p1131_p0 }
 0x336   : > { %p1129_p13 = pneg %p1128_p9 }
 0x338   : > { %p1134_p4 = pnand %p1133_p3, %p1129_p13 }
 0x344   : > { %v1430_v52 = vpop.permute.xlu2 %1031 }
 0x345   : > { %v1034_v8 = vunpack.i.h.bf16 %v1430_v52  ;;  %v1033_v9 = vunpack.i.l.bf16 %v1430_v52 }
 0x347   : > { %v619_v26 = vsel %vm617_vm14, %v1033_v9, %v1034_v8 }
 0x348   : > { %v738_v40 = vsel %vm404_vm4, %v1408_v57, %v619_v26 }
 0x359   : > { %v1432_v54 = vpop.permute.xlu0 %611 }
 0x35a   : > { %v618_v44 = vsel %vm617_vm14, %v1432_v54, %v1033_v9 }
 0x35b   : > { %v737_v57 = vsel %vm404_vm4, %v1406_v56, %v618_v44 }
 0x365   : > { %v1436_v59 = vpop.permute.xlu0 %1036 }
 0x366   : > { %v1039_v13 = vunpack.i.h.bf16 %v1436_v59  ;;  %v1038_v14 = vunpack.i.l.bf16 %v1436_v59 }
 0x368   : > { %v636_v33 = vsel %vm634_vm1, %v1038_v14, %v1039_v13 }
 0x369   : > { %v740_v41 = vsel %vm332_vm0, %v738_v40, %v636_v33 }
 0x36e   : > { %v1434_v55 = vpop.permute.xlu1 %1041 }
 0x36f   : > { %v1044_v0 = vunpack.i.h.bf16 %v1434_v55  ;;  %v1043_v17 = vunpack.i.l.bf16 %v1434_v55 }
 0x370   : > { %v1057_v58 = vpop.permute.xlu2 %1056 }
 0x371   : > { %v1059_v11 = vunpack.i.h.bf16 %v1057_v58  ;;  %v1058_v12 = vunpack.i.l.bf16 %v1057_v58  ;;  %v653_v36 = vsel %vm651_vm7, %v1043_v17, %v1044_v0 }
 0x372   : > { %v743_v43 = vsel %vm741_vm8, %v740_v41, %v653_v36 }
 0x373   : > { %v703_v25 = vsel %vm701_vm15, %v1058_v12, %v1059_v11 }
 0x376   : > { %v1047_v61 = vpop.permute.xlu0 %1046 }
 0x377   : > { %v1049_v4 = vunpack.i.h.bf16 %v1047_v61  ;;  %v1048_v6 = vunpack.i.l.bf16 %v1047_v61 }
 0x379   : > { %v1062_v47 = vpop.permute.xlu2 %1061  ;;  %v669_v15 = vsel %vm667_vm13, %v1048_v6, %v1049_v4 }
 0x37a   : > { %v1064_v20 = vunpack.i.h.bf16 %v1062_v47  ;;  %v1063_v21 = vunpack.i.l.bf16 %v1062_v47 }
 0x37c   : > { %v720_v35 = vsel %vm718_vm6, %v1063_v21, %v1064_v20 }
 0x37e   : > { %v662_v7 = vpop.permute.xlu0 %661 }
 0x37f   : > { %v1052_v60 = vpop.permute.xlu1 %1051  ;;  %v668_v22 = vsel %vm667_vm13, %v662_v7, %v1048_v6 }
 0x380   : > { %v1054_v1 = vunpack.i.h.bf16 %v1052_v60  ;;  %v1053_v2 = vunpack.i.l.bf16 %v1052_v60 }
 0x381   : > { %v729_v63 = vpop.permute.xlu2 %728 }
 0x382   : > { %v686_v10 = vsel %vm684_vm12, %v1053_v2, %v1054_v1 }
 0x383   : > { %v745_v19 = vsel %vm404_vm4, %v669_v15, %v686_v10 }
 0x384   : > { %v747_v30 = vsel %vm332_vm0, %v745_v19, %v703_v25 }
 0x385   : > { %v749_v38 = vsel %vm741_vm8, %v747_v30, %v720_v35 }
 0x387   : > { %v679_v62 = vpop.permute.xlu1 %678 }
 0x388   : > { %v685_v16 = vsel %vm684_vm12, %v679_v62, %v1053_v2 }
 0x389   : > { %v744_v23 = vsel %vm404_vm4, %v668_v22, %v685_v16  ;;  %v713_v24 = vpop.permute.xlu2 %712 }
 0x38a   : > { %v719_v34 = vsel %vm718_vm6, %v713_v24, %v1063_v21 }
 0x38f   : > { %v696_v3 = vpop.permute.xlu1 %695 }
 0x390   : > { %v702_v18 = vsel %vm701_vm15, %v696_v3, %v1058_v12 }
 0x391   : > { %v746_v29 = vsel %vm332_vm0, %v744_v23, %v702_v18 }
 0x392   : > { %v748_v37 = vsel %vm741_vm8, %v746_v29, %v719_v34 }
 0x398   : > { %v731_v27 = vpop.permute.xlu0 %730  ;;  %v733_v28 = vpop.permute.xlu1 %732 }
 0x399   : > { %v735_v31 = vsel %vm734_vm3, %v729_v63, %v731_v27  ;;  %v736_v32 = vsel %vm734_vm3, %v731_v27, %v733_v28 }
 0x39a   : > { %950 = vmatpush.msk.msra.mxu2 %vm404_vm4, %v735_v31  ;;  %952 = vmatpush.msk.msra.mxu3 %vm404_vm4, %v736_v32 }
 0x39c   : > { %774 = vmatpush.msra.mxu2 %v748_v37  ;;  %794 = vmatpush.msra.mxu3 %v749_v38 }
 0x39e   : > { %795 = vmatpush.msra.mxu3 %v743_v43 }
 0x39f   : > { %953 = vmatmul.msk.f32.vlgmr.msra.gmra.mxu3 %vm574_vm5, %v750_v42 }
 0x3a0   : > { %v629_v45 = vpop.permute.xlu0 %628  ;;  %v646_v46 = vpop.permute.xlu1 %645 }
 0x3a1   : > { %v635_v48 = vsel %vm634_vm1, %v629_v45, %v1038_v14  ;;  %v652_v49 = vsel %vm651_vm7, %v646_v46, %v1043_v17 }
 0x3a2   : > { %v739_v39 = vsel %vm332_vm0, %v737_v57, %v635_v48 }
 0x3a3   : > { %v742_v50 = vsel %vm741_vm8, %v739_v39, %v652_v49 }
 0x3a4   : > { %775 = vmatpush.msra.mxu2 %v742_v50 }
 0x3a5   : > { %951 = vmatmul.msk.f32.vlgmr.msra.gmra.mxu2 %vm574_vm5, %v750_v42 }
 0x422   : > { %v797_v53 = vpop.f32.mrf.mxu3 }
 0x423   : > { %v798_v52 = vadd.f32 %v797_v53, %v752_v51 }
 0x425   : > { %v955_v54 = vmul.f32 -1.442695, %v798_v52 }
 0x427   : > { %1072 = vpow2.f32 %v955_v54 }
 0x428   : > { %v777_v55 = vpop.f32.mrf.mxu2 }
 0x429   : > { %v778_v58 = vadd.f32 %v777_v55, %v752_v51 }
 0x42b   : > { %v954_v56 = vmul.f32 -1.442695, %v778_v58 }
 0x42d   : > { %v1073_v59 = vpop.eup %1072  ;;  %1074 = vpow2.f32 %v954_v56 }
 0x42e   : > { %v807_v60 = vadd.f32 1.0, %v1073_v59 }
 0x430   : > { %1076 = vrcp.f32 %v807_v60  ;;  %v834_v2 = vand.u32 2147483648, %v807_v60  ;;  %v832_v4 = vand.u32 2147483647, %v807_v60  ;;  %vm828_vm2 = vweird.f32 %v807_v60 }
 0x432   : > { %v835_v9 = vor.u32 1.1754944e-38, %v834_v2  ;;  %vm833_vm9 = vcmp.eq.f32.partialorder %v832_v4, 8.507059e+37 }
 0x433   : > { %v1075_v47 = vpop.eup %1074 }
 0x434   : > { %v806_v61 = vadd.f32 1.0, %v1075_v47 }
 0x436   : > { %v1077_v62 = vpop.eup %1076  ;;  %1078 = vrcp.f32 %v806_v61  ;;  %v819_v12 = vand.u32 2147483648, %v806_v61  ;;  %v817_v15 = vand.u32 2147483647, %v806_v61  ;;  %vm813_vm11 = vweird.f32 %v806_v61 }
 0x437   : > { %v824_v63 = vmul.f32 %v1077_v62, %v807_v60  ;;  %vm829_vm4 = vweird.f32 %v1077_v62 }
 0x438   : > { %vm830_vm5 = vmor %vm828_vm2, %vm829_vm4  ;;  %v820_v17 = vor.u32 1.1754944e-38, %v819_v12  ;;  %vm818_vm13 = vcmp.eq.f32.partialorder %v817_v15, 8.507059e+37 }
 0x439   : > { %v825_v1 = vsub.f32 1.0, %v824_v63 }
 0x43b   : > { %v826_v3 = vmul.f32 %v1077_v62, %v825_v1 }
 0x43c   : > { %v1079_v6 = vpop.eup %1078 }
 0x43d   : > { %v827_v7 = vadd.f32 %v1077_v62, %v826_v3  ;;  %v809_v8 = vmul.f32 %v1079_v6, %v806_v61  ;;  %vm814_vm10 = vweird.f32 %v1079_v6 }
 0x43e   : > { %vm815_vm12 = vmor %vm813_vm11, %vm814_vm10 }
 0x43f   : > { %v810_v10 = vsub.f32 1.0, %v809_v8  ;;  %v831_v11 = vsel %vm830_vm5, %v1077_v62, %v827_v7 }
 0x440   : > { %v836_v13 = vsel %vm833_vm9, %v835_v9, %v831_v11 }
 0x441   : > { %v811_v14 = vmul.f32 %v1079_v6, %v810_v10  ;;  %v839_v0 = vperm.slane %v836_v13, 0 }
 0x443   : > { %v812_v16 = vadd.f32 %v1079_v6, %v811_v14  ;;  %v842_v21 = vrot.slane %v839_v0, 4 }
 0x445   : > { %v816_v18 = vsel %vm815_vm12, %v1079_v6, %v812_v16 }
 0x446   : > { %v821_v19 = vsel %vm818_vm13, %v820_v17, %v816_v18 }
 0x447   : > { %v838_v20 = vperm.slane %v821_v19, 0 }
 0x449   : > { %v843_v22 = vsel %vm332_vm0, %v838_v20, %v842_v21 }
 0x44a   : > { %v845_v23 = vmul.f32 %v843_v22, %v1387_v5 }
 0x44c   : > { %846 = vst [vmem:[%s324_s25] sm:$0xff] %v845_v23 }
 0x44d   : > { %1137 = shalt.err (!%p1134_p4)
}
 0x44e   : > { %965 = dma.vmem_to_hbm [thread:$0]  (%p1296_p11), %s862_s27, 128, %s864_s6, %s848_s17  }
 0x44f PF: > { %s875_s20 = sand.u32 1, %s1164_s29   ;;  %p1532_p7 = scmp.ge.s32.totalorder %s1176_s10, 2 }
 0x450   : > { %s876_s22 = scalar_lea.sflag [#allocation6], %s875_s20 }
 0x451   : > { %p972_p5 = pnand %p1532_p7, %p1300_p12 }
 0x453   : > { %p973_p8 = pneg %p972_p5 }
 0x455   : > { %1159 = dma.done.wait (%p973_p8), %s876_s22, 128  }
 0x456   : > { %1161 = vsyncadd (%p973_p8), %s876_s22, 4294967168  ;;  %s1533_s16 = sld [smem:[#allocation10_spill]]  ;;  %p22_p10 = scmp.ge.s32.totalorder %s1271_s12, 4  }
 0x457   : > { %s1534_s29 = smov %s1168_s30  ;;  %s1535_s30 = smov %s1172_s9 }
 0x458   : > { %s1537_s10 = smov %s1271_s12  ;;  %24 = sbr.rel (!%p22_p10) target bundleno = 7 (0x7), region = 105 }
 0x45c   : > { %s1536_s9 = smov %s1533_s16 }
 0x45d   :  { %882 = vsyncpa [#allocation5], 1 }
 0x45e   :  { %884 = vsyncpa [#allocation5 + $0x1], 1 }
 0x45f   :  { %885 = vsyncpa [#allocation6], 1 }
 0x460   :  { %887 = vsyncpa [#allocation6 + $0x1], 1 }

</bundles_post_ra>
